<compile_context>
chip_gen: v6e
topology: v6e:2x2x1
jax: 0.10.0
libtpu: 0.0.40
codegen_flags: <defaults>
</compile_context>

<pallas_src>
import jax
import jax.numpy as jnp
from jax.experimental import pallas as pl
from jax.experimental.pallas import tpu as pltpu

LANES = 128
SUBLANES = 8


def _round_up(x, m):
    return ((x + m - 1) // m) * m


# ---------------------------------------------------------------------------
# Kernel
# ---------------------------------------------------------------------------
def critic_kernel(x_ref, w1_ref, w23_ref, aux_ref, out_ref):
    """One batch tile of the 4-layer critic MLP.

    x_ref   : (TB, SD_PAD) f32   state rows (feature dim padded to mult. of 8)
    w1_ref  : (SD_PAD, 128) bf16 zero-padded W1 (in, out), resident
    w23_ref : (2, 128, 128) bf16 zero-padded W2, W3 (in, out), resident
    aux_ref : (8, 128) f32       rows 0..2 = b1,b2,b3 ; row 3 = fc4 weight row ;
                                 aux[4, 0] = fc4 bias
    out_ref : (1, TB) f32        state values, lane-major (one value per lane)
    """
    mxu_dt = w1_ref.dtype
    f32 = jnp.float32

    x = x_ref[...]
    h = jnp.tanh(jnp.dot(x.astype(mxu_dt), w1_ref[...],
                         preferred_element_type=f32) + aux_ref[0:1, :])
    h = jnp.tanh(jnp.dot(h.astype(mxu_dt), w23_ref[0],
                         preferred_element_type=f32) + aux_ref[1:2, :])
    h = jnp.tanh(jnp.dot(h.astype(mxu_dt), w23_ref[1],
                         preferred_element_type=f32) + aux_ref[2:3, :])

    # fc4 has a single output column: contract h's lane axis against the fc4
    # weight row -> (1, TB).  This keeps the output store lane-dense (no
    # masked vst on a last-dim-of-1 output, 128x less HBM writeback).
    v = jax.lax.dot_general(
        aux_ref[3:4, :], h,
        dimension_numbers=(((1,), (1,)), ((), ())),
        preferred_element_type=f32)                      # (1, TB)
    out_ref[...] = (v + aux_ref[4:5, 0:1]).astype(out_ref.dtype)


# ---------------------------------------------------------------------------
# Parameter packing (call ONCE per parameter update, not per forward)
# ---------------------------------------------------------------------------
def pack_critic_params(params, *, mxu_dtype=jnp.bfloat16):
    """Pack the 9 tiny Linear parameters into 3 VMEM-friendly slabs.

    Zero padding is exact through the network: padded weight rows/cols and
    padded bias lanes are 0, tanh(0) = 0, and the fc4 weight row is 0 on
    padded lanes, so padded lanes never contribute to the value.
    """
    f32 = jnp.float32
    state_dim, h0 = params["w1"].shape
    h1 = params["w2"].shape[1]
    h2 = params["w3"].shape[1]
    assert max(state_dim, h0, h1, h2) <= LANES, "feature dims must fit in 128 lanes"
    sd_pad = _round_up(state_dim, SUBLANES)

    w1 = jnp.zeros((sd_pad, LANES), f32)
    w1 = w1.at[:state_dim, :h0].set(params["w1"].astype(f32)).astype(mxu_dtype)

    w23 = jnp.zeros((2, LANES, LANES), f32)
    w23 = w23.at[0, :h0, :h1].set(params["w2"].astype(f32))
    w23 = w23.at[1, :h1, :h2].set(params["w3"].astype(f32))
    w23 = w23.astype(mxu_dtype)

    aux = jnp.zeros((8, LANES), f32)
    aux = aux.at[0, :h0].set(params["b1"].reshape(-1).astype(f32))
    aux = aux.at[1, :h1].set(params["b2"].reshape(-1).astype(f32))
    aux = aux.at[2, :h2].set(params["b3"].reshape(-1).astype(f32))
    aux = aux.at[3, :h2].set(params["w4"].reshape(-1).astype(f32))
    aux = aux.at[4, 0].set(params["b4"].reshape(()).astype(f32))

    meta = dict(state_dim=state_dim, sd_pad=sd_pad, h0=h0, h1=h1, h2=h2)
    return {"w1": w1, "w23": w23, "aux": aux, "meta": meta}


# ---------------------------------------------------------------------------
# Forward wrapper
# ---------------------------------------------------------------------------
def critic_forward(state, packed, *, tile_b=2048):
    """state: (B, state_dim) f32.  packed: output of pack_critic_params."""
    B, state_dim = state.shape
    meta = packed["meta"]
    assert state_dim == meta["state_dim"]
    sd_pad = meta["sd_pad"]
    h0, h1, h2 = meta["h0"], meta["h1"], meta["h2"]

    # Batch tile: multiple of 128 (lane-major output), capped at tile_b, and
    # sized off B so large batches give >= 2 tiles (v7x megacore split).
    tb = min(_round_up(max((B + 1) // 2, 1), LANES), _round_up(tile_b, LANES))
    b_pad = _round_up(B, tb)
    n_tiles = b_pad // tb

    f32 = jnp.float32
    x = state.astype(f32)
    if (b_pad, sd_pad) != (B, state_dim):
        # Only the batch dim (and feature dim up to a multiple of 8) is padded;
        # padded rows are discarded by the final slice.
        x = jnp.zeros((b_pad, sd_pad), f32).at[:B, :state_dim].set(x)

    w1, w23, aux = packed["w1"], packed["w23"], packed["aux"]

    flops = 2 * B * (state_dim * h0 + h0 * h1 + h1 * h2 + h2)
    transcendentals = B * (h0 + h1 + h2)
    bytes_accessed = int(
        x.size * x.dtype.itemsize
        + w1.size * w1.dtype.itemsize
        + w23.size * w23.dtype.itemsize
        + aux.size * aux.dtype.itemsize
        + b_pad * 4)

    out_slab = pl.pallas_call(
        critic_kernel,
        out_shape=jax.ShapeDtypeStruct((n_tiles, tb), f32),
        grid_spec=pltpu.PrefetchScalarGridSpec(
            num_scalar_prefetch=0,
            grid=(n_tiles,),
            in_specs=[
                pl.BlockSpec((tb, sd_pad), lambda i: (i, 0)),          # state tile
                pl.BlockSpec((sd_pad, LANES), lambda i: (0, 0)),       # W1 (resident)
                pl.BlockSpec((2, LANES, LANES), lambda i: (0, 0, 0)),  # W2, W3 (resident)
                pl.BlockSpec((8, LANES), lambda i: (0, 0)),            # biases + fc4 row
            ],
            out_specs=pl.BlockSpec((1, tb), lambda i: (i, 0)),         # lane-major values
        ),
        compiler_params=pltpu.CompilerParams(
            dimension_semantics=("parallel",)),
        cost_estimate=pl.CostEstimate(
            flops=flops,
            transcendentals=transcendentals,
            bytes_accessed=bytes_accessed),
    )(x, w1, w23, aux)

    # (n_tiles, tb) row-major == batch order; slice off the padded rows.
    return out_slab.reshape(-1)[:B].reshape(B, 1)


# ---------------------------------------------------------------------------
# Init + pure-JAX reference (mirrors the PyTorch module)
# ---------------------------------------------------------------------------
def init_critic_params(key, state_dim, hidden_layer):
    """Orthogonal weights (gain=1.0), zero biases — mirrors orthogonal_init."""
    h0, h1, h2 = hidden_layer
    ortho = jax.nn.initializers.orthogonal(scale=1.0)
    k1, k2, k3, k4 = jax.random.split(key, 4)
    # torch Linear weight is (out, in); build it that way then transpose to (in, out).
    w1 = ortho(k1, (h0, state_dim), jnp.float32).T
    w2 = ortho(k2, (h1, h0), jnp.float32).T
    w3 = ortho(k3, (h2, h1), jnp.float32).T
    w4 = ortho(k4, (1, h2), jnp.float32).T
    return {
        "w1": w1, "b1": jnp.zeros((1, h0), jnp.float32),
        "w2": w2, "b2": jnp.zeros((1, h1), jnp.float32),
        "w3": w3, "b3": jnp.zeros((1, h2), jnp.float32),
        "w4": w4, "b4": jnp.zeros((1, 1), jnp.float32),
    }


def critic_ref(state, p):
    """Full-precision pure-JAX reference."""
    hi = jax.lax.Precision.HIGHEST
    h = jnp.tanh(jnp.dot(state, p["w1"], precision=hi) + p["b1"])
    h = jnp.tanh(jnp.dot(h, p["w2"], precision=hi) + p["b2"])
    h = jnp.tanh(jnp.dot(h, p["w3"], precision=hi) + p["b3"])
    return jnp.dot(h, p["w4"], precision=hi) + p["b4"]


if __name__ == "__main__":
    key = jax.random.PRNGKey(0)
    k_state, k_params = jax.random.split(key)

    B = 8
    state_dim = 16
    hidden_layer = (32, 32, 32)   # para.hidden_layer

    state = jax.random.normal(k_state, (B, state_dim), dtype=jnp.float32)
    params = init_critic_params(k_params, state_dim, hidden_layer)

    # Pack once (per parameter update), run the kernel.
    packed = pack_critic_params(params, mxu_dtype=jnp.bfloat16)
    out = critic_forward(state, packed)
    out = jax.block_until_ready(out)

    ref = critic_ref(state, params)
    assert out.shape == (B, 1), out.shape
    # bf16 MXU operands with f32 accumulation: errors are ~1e-3 for these
    # tanh-bounded activations; keep a comfortable margin.
    max_err = float(jnp.max(jnp.abs(out - ref)))
    assert max_err < 1e-2, f"max abs err {max_err}"

    print("KERNEL_OK")
</pallas_src>

<mosaic_0001>
module attributes {stable_mosaic.version = 11 : i64} {
  func.func @critic_kernel(%arg0: i32, %arg1: memref<128x16xf32, #tpu.memory_space<vmem>>, %arg2: memref<16x128xbf16, #tpu.memory_space<vmem>>, %arg3: memref<2x128x128xbf16, #tpu.memory_space<vmem>>, %arg4: memref<8x128xf32, #tpu.memory_space<vmem>>, %arg5: memref<1x128xf32, #tpu.memory_space<vmem>>) attributes {dimension_semantics = [#tpu.dimension_semantics<parallel>], iteration_bounds = array<i64: 1>, scalar_prefetch = 0 : i64, scratch_operands = 0 : i64, tpu.core_type = #tpu.core_type<tc>, window_params = [{transform_indices = @transform_0, window_bounds = array<i64: 128, 16>}, {pipeline_mode = #tpu.pipeline_mode<synchronous>, transform_indices = @transform_1, window_bounds = array<i64: 16, 128>}, {pipeline_mode = #tpu.pipeline_mode<synchronous>, transform_indices = @transform_2, window_bounds = array<i64: 2, 128, 128>}, {pipeline_mode = #tpu.pipeline_mode<synchronous>, transform_indices = @transform_3, window_bounds = array<i64: 8, 128>}, {transform_indices = @transform_4, window_bounds = array<i64: 1, 128>}]} {
    %c0 = arith.constant 0 : index
    %c0_0 = arith.constant 0 : index
    %0 = vector.load %arg1[%c0, %c0_0] : memref<128x16xf32, #tpu.memory_space<vmem>>, vector<128x16xf32>
    %1 = arith.truncf %0 : vector<128x16xf32> to vector<128x16xbf16>
    %c0_1 = arith.constant 0 : index
    %c0_2 = arith.constant 0 : index
    %2 = vector.load %arg2[%c0_1, %c0_2] : memref<16x128xbf16, #tpu.memory_space<vmem>>, vector<16x128xbf16>
    %cst = arith.constant dense<0.000000e+00> : vector<128x128xf32>
    %3 = tpu.matmul %1, %2, %cst {dimension_numbers = #tpu.dot_dimension_numbers<[1], [0], [0], [1], [0, 0, 1, 1], [], []>} : vector<128x16xbf16>, vector<16x128xbf16>, vector<128x128xf32> -> vector<128x128xf32>
    %c0_3 = arith.constant 0 : index
    %c0_4 = arith.constant 0 : index
    %4 = vector.load %arg4[%c0_3, %c0_4] : memref<8x128xf32, #tpu.memory_space<vmem>>, vector<1x128xf32>
    %5 = vector.broadcast %4 : vector<1x128xf32> to vector<128x128xf32>
    %6 = arith.addf %3, %5 : vector<128x128xf32>
    %7 = math.tanh %6 : vector<128x128xf32>
    %8 = arith.truncf %7 : vector<128x128xf32> to vector<128x128xbf16>
    %c0_5 = arith.constant 0 : index
    %c0_6 = arith.constant 0 : index
    %c0_7 = arith.constant 0 : index
    %9 = vector.load %arg3[%c0_5, %c0_6, %c0_7] : memref<2x128x128xbf16, #tpu.memory_space<vmem>>, vector<1x128x128xbf16>
    %10 = vector.shape_cast %9 : vector<1x128x128xbf16> to vector<128x128xbf16>
    %cst_8 = arith.constant dense<0.000000e+00> : vector<128x128xf32>
    %11 = tpu.matmul %8, %10, %cst_8 {dimension_numbers = #tpu.dot_dimension_numbers<[1], [0], [0], [1], [0, 0, 1, 1], [], []>} : vector<128x128xbf16>, vector<128x128xbf16>, vector<128x128xf32> -> vector<128x128xf32>
    %c1 = arith.constant 1 : index
    %c0_9 = arith.constant 0 : index
    %12 = vector.load %arg4[%c1, %c0_9] : memref<8x128xf32, #tpu.memory_space<vmem>>, vector<1x128xf32>
    %13 = vector.broadcast %12 : vector<1x128xf32> to vector<128x128xf32>
    %14 = arith.addf %11, %13 : vector<128x128xf32>
    %15 = math.tanh %14 : vector<128x128xf32>
    %16 = arith.truncf %15 : vector<128x128xf32> to vector<128x128xbf16>
    %c1_10 = arith.constant 1 : index
    %c0_11 = arith.constant 0 : index
    %c0_12 = arith.constant 0 : index
    %17 = vector.load %arg3[%c1_10, %c0_11, %c0_12] : memref<2x128x128xbf16, #tpu.memory_space<vmem>>, vector<1x128x128xbf16>
    %18 = vector.shape_cast %17 : vector<1x128x128xbf16> to vector<128x128xbf16>
    %cst_13 = arith.constant dense<0.000000e+00> : vector<128x128xf32>
    %19 = tpu.matmul %16, %18, %cst_13 {dimension_numbers = #tpu.dot_dimension_numbers<[1], [0], [0], [1], [0, 0, 1, 1], [], []>} : vector<128x128xbf16>, vector<128x128xbf16>, vector<128x128xf32> -> vector<128x128xf32>
    %c2 = arith.constant 2 : index
    %c0_14 = arith.constant 0 : index
    %20 = vector.load %arg4[%c2, %c0_14] : memref<8x128xf32, #tpu.memory_space<vmem>>, vector<1x128xf32>
    %21 = vector.broadcast %20 : vector<1x128xf32> to vector<128x128xf32>
    %22 = arith.addf %19, %21 : vector<128x128xf32>
    %23 = math.tanh %22 : vector<128x128xf32>
    %c3 = arith.constant 3 : index
    %c0_15 = arith.constant 0 : index
    %24 = vector.load %arg4[%c3, %c0_15] : memref<8x128xf32, #tpu.memory_space<vmem>>, vector<1x128xf32>
    %cst_16 = arith.constant dense<0.000000e+00> : vector<1x128xf32>
    %25 = tpu.matmul %24, %23, %cst_16 {dimension_numbers = #tpu.dot_dimension_numbers<[1], [1], [0], [0], [0, 0, 1, 0], [], []>} : vector<1x128xf32>, vector<128x128xf32>, vector<1x128xf32> -> vector<1x128xf32>
    %c4 = arith.constant 4 : index
    %c0_17 = arith.constant 0 : index
    %26 = vector.load %arg4[%c4, %c0_17] : memref<8x128xf32, #tpu.memory_space<vmem>>, vector<1x1xf32>
    %27 = vector.broadcast %26 : vector<1x1xf32> to vector<1x128xf32>
    %28 = arith.addf %25, %27 : vector<1x128xf32>
    %c0_18 = arith.constant 0 : index
    %c0_19 = arith.constant 0 : index
    %29 = vector.load %arg5[%c0_18, %c0_19] : memref<1x128xf32, #tpu.memory_space<vmem>>, vector<1x128xf32>
    tpu.vector_store %arg5[%c0_18, %c0_19], %28 {strides = array<i32>} : memref<1x128xf32, #tpu.memory_space<vmem>>, vector<1x128xf32>,
    return
  }
  func.func @transform_0(%arg0: i32) -> (i32, i32) {
    %c0_i32 = arith.constant 0 : i32
    %c0_i32_0 = arith.constant 0 : i32
    return %arg0, %c0_i32 : i32, i32
  }
  func.func @transform_1(%arg0: i32) -> (i32, i32) {
    %c0_i32 = arith.constant 0 : i32
    %c0_i32_0 = arith.constant 0 : i32
    %c0_i32_1 = arith.constant 0 : i32
    return %c0_i32, %c0_i32_0 : i32, i32
  }
  func.func @transform_2(%arg0: i32) -> (i32, i32, i32) {
    %c0_i32 = arith.constant 0 : i32
    %c0_i32_0 = arith.constant 0 : i32
    %c0_i32_1 = arith.constant 0 : i32
    %c0_i32_2 = arith.constant 0 : i32
    return %c0_i32, %c0_i32_0, %c0_i32_1 : i32, i32, i32
  }
  func.func @transform_3(%arg0: i32) -> (i32, i32) {
    %c0_i32 = arith.constant 0 : i32
    %c0_i32_0 = arith.constant 0 : i32
    %c0_i32_1 = arith.constant 0 : i32
    return %c0_i32, %c0_i32_0 : i32, i32
  }
  func.func @transform_4(%arg0: i32) -> (i32, i32) {
    %c0_i32 = arith.constant 0 : i32
    %c0_i32_0 = arith.constant 0 : i32
    return %arg0, %c0_i32 : i32, i32
  }
}

</mosaic_0001>

<bundles_post_ra>
// kernel: tpu_custom_call.1
= control target key start
LH: loop header
LB: loop body
LE: loop exit
PB: predicated region body
PF: predicated region fallthrough
CT: control target
= control target key end

     0   :  { %vm56_vm0 = vcmask 130048   ;;  %s1224_s0 = inlined_call_operand.vmem [shape: f32[128,16], index: 0, kind: input, shape index: {}]   ;;  %s1225_s1 = inlined_call_operand.vmem [shape: bf16[16,128], index: 1, kind: input, shape index: {}]   ;;  %s1226_s2 = inlined_call_operand.vmem [shape: bf16[2,128,128], index: 2, kind: input, shape index: {}]   ;;  %s1227_s3 = inlined_call_operand.vmem [shape: f32[8,128], index: 3, kind: input, shape index: {}]   ;;  %s1228_s4 = inlined_call_operand.hbm [shape: f32[1,128], index: 4, kind: output, shape index: {}]  }
   0x1   :  { %v891_v0 = vld [vmem:[%s1225_s1] sm:$0xff]   ;;  %v20_v2 = vld [vmem:[%s1224_s0 + $0x8] sm:$0xff]  ;;  %v21_v3 = vld [vmem:[%s1224_s0 + $0x10] sm:$0xff] }
   0x2   :  { %v19_v1 = vld [vmem:[%s1224_s0] sm:$0xff]  ;;  %769 = vmatprep.subr.bf16.mxu0 %v891_v0  ;;  %v22_v5 = vld [vmem:[%s1224_s0 + $0x18] sm:$0xff]  ;;  %v24_v7 = vld [vmem:[%s1224_s0 + $0x28] sm:$0xff] }
   0x3   :  { %v35_v4 = vpack.c.bf16 %v20_v2, %v19_v1  ;;  %v23_v6 = vld [vmem:[%s1224_s0 + $0x20] sm:$0xff]  ;;  %770 = vmatpush3.bf16.msra.mxu0 %v891_v0  ;;  %v36_v8 = vpack.c.bf16 %v22_v5, %v21_v3  ;;  %v25_v10 = vld [vmem:[%s1224_s0 + $0x30] sm:$0xff]  ;;  %v26_v11 = vld [vmem:[%s1224_s0 + $0x38] sm:$0xff] }
   0x4   :  { %v37_v9 = vpack.c.bf16 %v24_v7, %v23_v6  ;;  %v27_v12 = vld [vmem:[%s1224_s0 + $0x40] sm:$0xff]  ;;  %v28_v13 = vld [vmem:[%s1224_s0 + $0x48] sm:$0xff]  ;;  %v892_v14 = vld [vmem:[%s1226_s2 + $0x38] sm:$0xff]   ;;  %v38_v16 = vpack.c.bf16 %v26_v11, %v25_v10 }
   0x5   :  { %771 = vmatprep.mubr.msk.bf16.mxu0 %vm56_vm0, %v35_v4  ;;  %v893_v15 = vld [vmem:[%s1226_s2 + $0x30] sm:$0xff]   ;;  %787 = vmatprep.subr.bf16.mxu1 %v892_v14  ;;  %v39_v17 = vpack.c.bf16 %v28_v13, %v27_v12  ;;  %v30_v19 = vld [vmem:[%s1224_s0 + $0x58] sm:$0xff]  ;;  %v31_v20 = vld [vmem:[%s1224_s0 + $0x60] sm:$0xff] }
   0x6   :  { %772 = vmatmul.mubr.msk.bf16.vlgmr.msra.gmra.mxu0 %vm56_vm0, %v36_v8  ;;  %788 = vmatpush3.bf16.msra.mxu1 %v892_v14  ;;  %v29_v18 = vld [vmem:[%s1224_s0 + $0x50] sm:$0xff]  ;;  %v32_v21 = vld [vmem:[%s1224_s0 + $0x68] sm:$0xff] }
   0x7   :  { %775 = vmatprep.mubr.msk.bf16.mxu0 %vm56_vm0, %v37_v9  ;;  %789 = vmatprep.subr.bf16.mxu1 %v893_v15 }
   0xa   :  { %790 = vmatpush3.bf16.msra.mxu1 %v893_v15 }
   0xe   :  { %776 = vmatmul.mubr.msk.bf16.gmra.mxu0 %vm56_vm0, %v38_v16 }
   0xf   :  { %779 = vmatprep.mubr.msk.bf16.mxu0 %vm56_vm0, %v39_v17 }
  0x10   :  { %9 = vsyncpa [#allocation3], 0  ;;  %v40_v22 = vpack.c.bf16 %v30_v19, %v29_v18  ;;  %v41_v23 = vpack.c.bf16 %v32_v21, %v31_v20  ;;  %v33_v24 = vld [vmem:[%s1224_s0 + $0x70] sm:$0xff]  ;;  %v34_v25 = vld [vmem:[%s1224_s0 + $0x78] sm:$0xff]  ;;  %vm1027_vm1 = vmmov 0   ;;  %s1029_s7 = smov [#allocation2]  }
  0x11   :  { %v42_v26 = vpack.c.bf16 %v34_v25, %v33_v24  ;;  %v894_v27 = vld [vmem:[%s1226_s2 + $0x28] sm:$0xff]   ;;  %v895_v28 = vld [vmem:[%s1226_s2 + $0x20] sm:$0xff]   ;;  %v896_v29 = vld [vmem:[%s1226_s2 + $0x18] sm:$0xff]   ;;  %s659_s8 = sshll.u32 %s1029_s7, 4  ;;  %s660_s8 = int_to_ptr.vmem [resolvable:$true] %s659_s8 }
  0x12   :  { %791 = vmatprep.subr.bf16.mxu1 %v894_v27  ;;  %v897_v30 = vld [vmem:[%s1226_s2 + $0x10] sm:$0xff]   ;;  %v898_v31 = vld [vmem:[%s1226_s2 + $0x8] sm:$0xff]   ;;  %v899_v32 = vld [vmem:[%s1226_s2] sm:$0xff]   ;;  %s1004_s9 = scalar_lea.vmem %s660_s8, 16  ;;  %s1008_s10 = scalar_lea.vmem %s660_s8, 32 }
  0x13   :  { %792 = vmatpush3.bf16.msra.mxu1 %v894_v27  ;;  %v900_v33 = vld [vmem:[%s1226_s2 + $0x78] sm:$0xff]   ;;  %v901_v34 = vld [vmem:[%s1226_s2 + $0x70] sm:$0xff]   ;;  %v667_v36 = vld [vmem:[%s1227_s3] ss:$0 sm:$0xff]  ;;  %p1005_p0 = scmp.ne.s32.totalorder %s660_s8, %s1004_s9  ;;  %p1009_p1 = scmp.lt.s32.totalorder %s660_s8, %s660_s8 }
  0x14   :  { %793 = vmatprep.subr.bf16.mxu1 %v895_v28  ;;  %819 = vmatprep.subr.bf16.mxu0 %v900_v33  ;;  %p1010_p2 = scmp.lt.s32.totalorder %s1008_s10, %s1004_s9 }
  0x15   :  { %820 = vmatpush3.bf16.msra.mxu0 %v900_v33  ;;  %v907_v33 = vld [vmem:[%s1226_s2 + $0x40] sm:$0xff]  }
  0x16   :  { %780 = vmatmul.mubr.msk.bf16.gmra.mxu0 %vm56_vm0, %v40_v22  ;;  %821 = vmatprep.subr.bf16.mxu0 %v901_v34  ;;  %p1011_p3 = por %p1010_p2, %p1009_p1 }
  0x17   :  { %783 = vmatprep.mubr.msk.bf16.mxu0 %vm56_vm0, %v41_v23  ;;  %794 = vmatpush3.bf16.msra.mxu1 %v895_v28  ;;  %v902_v28 = vld [vmem:[%s1226_s2 + $0x68] sm:$0xff]  }
  0x18   :  { %795 = vmatprep.subr.bf16.mxu1 %v896_v29  ;;  %p1012_p4 = pnand %p1011_p3, %p1005_p0 }
  0x19   :  { %822 = vmatpush3.bf16.msra.mxu0 %v901_v34 }
  0x1a   :  { %823 = vmatprep.subr.bf16.mxu0 %v902_v28 }
  0x1b   :  { %796 = vmatpush3.bf16.msra.mxu1 %v896_v29  ;;  %v903_v29 = vld [vmem:[%s1226_s2 + $0x60] sm:$0xff]  }
  0x1c   :  { %797 = vmatprep.subr.bf16.mxu1 %v897_v30 }
  0x1d   :  { %824 = vmatpush3.bf16.msra.mxu0 %v902_v28  ;;  %v576_v28 = vld [vmem:[%s1227_s3 + $0x4] sm:$0x1] }
  0x1e   :  { %784 = vmatmul.mubr.msk.bf16.gmra.mxu0 %vm56_vm0, %v42_v26  ;;  %825 = vmatprep.subr.bf16.mxu0 %v903_v29 }
  0x1f   :  { %798 = vmatpush3.bf16.msra.mxu1 %v897_v30  ;;  %v904_v30 = vld [vmem:[%s1226_s2 + $0x58] sm:$0xff]  }
  0x20   :  { %799 = vmatprep.subr.bf16.mxu1 %v898_v31 }
  0x21   :  { %826 = vmatpush3.bf16.msra.mxu0 %v903_v29  ;;  %v1028_v29 = vmov 0  }
  0x22   :  { %827 = vmatprep.subr.bf16.mxu0 %v904_v30  ;;  %890 = vset.pattern.permute.xlu0 %v1028_v29 }
  0x23   :  { %800 = vmatpush3.bf16.msra.mxu1 %v898_v31  ;;  %v905_v31 = vld [vmem:[%s1226_s2 + $0x50] sm:$0xff]   ;;  %579 = vperm.xlu0 %890, %v576_v28  }
  0x24   :  { %801 = vmatprep.subr.bf16.mxu1 %v899_v32 }
  0x25   :  { %828 = vmatpush3.bf16.msra.mxu0 %v904_v30 }
  0x26   :  { %829 = vmatprep.subr.bf16.mxu0 %v905_v31 }
  0x27   :  { %802 = vmatpush3.bf16.msra.mxu1 %v899_v32  ;;  %v906_v32 = vld [vmem:[%s1226_s2 + $0x48] sm:$0xff]  }
  0x29   :  { %830 = vmatpush3.bf16.msra.mxu0 %v905_v31 }
  0x2a   :  { %831 = vmatprep.subr.bf16.mxu0 %v906_v32 }
  0x2d   :  { %832 = vmatpush3.bf16.msra.mxu0 %v906_v32 }
  0x2e   :  { %833 = vmatprep.subr.bf16.mxu0 %v907_v33 }
  0x31   :  { %834 = vmatpush3.bf16.msra.mxu0 %v907_v33 }
  0xc6   :  { %v773_v35 = vpop.f32.mrf.mxu0 }
  0xc7   :  { %v124_v41 = vadd.f32 %v773_v35, %v667_v36  ;;  %v677_v35 = vld [vmem:[%s1227_s3 + $0x1] ss:$0 sm:$0xff] }
  0xc8   :  { %v115_v37 = vpop.f32.mrf.mxu0 }
  0xc9   :  { %v116_v38 = vadd.f32 %v667_v36, %v115_v37 }
  0xca   :  { %v774_v39 = vpop.f32.mrf.mxu0 }
  0xcb   :  { %v127_v40 = vadd.f32 %v774_v39, %v667_v36  ;;  %908 = vtanh.f32 %v116_v38 }
  0xcc   :  { %v118_v42 = vpop.f32.mrf.mxu0 }
  0xcd   :  { %v119_v43 = vadd.f32 %v667_v36, %v118_v42  ;;  %910 = vtanh.f32 %v127_v40 }
  0xce   :  { %v777_v44 = vpop.f32.mrf.mxu0 }
  0xcf   :  { %912 = vtanh.f32 %v119_v43  ;;  %v140_v49 = vadd.f32 %v777_v44, %v667_v36 }
  0xd0   :  { %914 = vtanh.f32 %v124_v41  ;;  %v131_v45 = vpop.f32.mrf.mxu0 }
  0xd1   :  { %v132_v46 = vadd.f32 %v667_v36, %v131_v45 }
  0xd2   :  { %v778_v47 = vpop.f32.mrf.mxu0 }
  0xd3   :  { %v143_v48 = vadd.f32 %v778_v47, %v667_v36  ;;  %916 = vtanh.f32 %v132_v46 }
  0xd4   :  { %v134_v50 = vpop.f32.mrf.mxu0 }
  0xd5   :  { %v135_v51 = vadd.f32 %v667_v36, %v134_v50  ;;  %918 = vtanh.f32 %v143_v48 }
  0xd6   :  { %v781_v52 = vpop.f32.mrf.mxu0 }
  0xd7   :  { %920 = vtanh.f32 %v135_v51  ;;  %v156_v60 = vadd.f32 %v781_v52, %v667_v36 }
  0xd8   :  { %922 = vtanh.f32 %v140_v49  ;;  %v147_v53 = vpop.f32.mrf.mxu0  ;;  %v909_v55 = vpop.eup %908 }
  0xd9   :  { %v148_v54 = vadd.f32 %v667_v36, %v147_v53 }
  0xda   :  { %v782_v56 = vpop.f32.mrf.mxu0  ;;  %v911_v57 = vpop.eup %910 }
  0xdb   :  { %v159_v58 = vadd.f32 %v782_v56, %v667_v36  ;;  %924 = vtanh.f32 %v148_v54 }
  0xdc   :  { %v913_v59 = vpop.eup %912  ;;  %v150_v61 = vpop.f32.mrf.mxu0 }
  0xdd   :  { %v915_v62 = vpop.eup %914  ;;  %v151_v63 = vadd.f32 %v667_v36, %v150_v61  ;;  %v194_v0 = vpack.c.bf16 %v913_v59, %v909_v55  ;;  %926 = vtanh.f32 %v159_v58 }
  0xde   :  { %v785_v1 = vpop.f32.mrf.mxu0  ;;  %v195_v2 = vpack.c.bf16 %v911_v57, %v915_v62 }
  0xdf   :  { %928 = vtanh.f32 %v151_v63  ;;  %803 = vmatprep.mubr.bf16.mxu1 %v194_v0  ;;  %v172_v10 = vadd.f32 %v785_v1, %v667_v36 }
  0xe0   :  { %930 = vtanh.f32 %v156_v60  ;;  %v163_v3 = vpop.f32.mrf.mxu0  ;;  %804 = vmatmul.mubr.bf16.vlgmr.msra.gmra.mxu1 %v195_v2  ;;  %v917_v5 = vpop.eup %916 }
  0xe1   :  { %v164_v4 = vadd.f32 %v667_v36, %v163_v3 }
  0xe2   :  { %v786_v6 = vpop.f32.mrf.mxu0  ;;  %v919_v7 = vpop.eup %918 }
  0xe3   :  { %v175_v8 = vadd.f32 %v786_v6, %v667_v36  ;;  %932 = vtanh.f32 %v164_v4 }
  0xe4   :  { %v921_v9 = vpop.eup %920  ;;  %v166_v11 = vpop.f32.mrf.mxu0 }
  0xe5   :  { %v923_v12 = vpop.eup %922  ;;  %v167_v13 = vadd.f32 %v667_v36, %v166_v11  ;;  %v196_v14 = vpack.c.bf16 %v921_v9, %v917_v5  ;;  %934 = vtanh.f32 %v175_v8 }
  0xe6   :  { %v197_v15 = vpack.c.bf16 %v919_v7, %v923_v12 }
  0xe7   :  { %936 = vtanh.f32 %v167_v13  ;;  %807 = vmatprep.mubr.bf16.mxu1 %v196_v14 }
  0xe8   :  { %938 = vtanh.f32 %v172_v10  ;;  %808 = vmatmul.mubr.bf16.gmra.mxu1 %v197_v15  ;;  %v925_v16 = vpop.eup %924 }
  0xea   :  { %v927_v17 = vpop.eup %926 }
  0xec   :  { %v929_v18 = vpop.eup %928 }
  0xed   :  { %v931_v19 = vpop.eup %930  ;;  %v198_v20 = vpack.c.bf16 %v929_v18, %v925_v16 }
  0xee   :  { %v199_v21 = vpack.c.bf16 %v927_v17, %v931_v19 }
  0xef   :  { %811 = vmatprep.mubr.bf16.mxu1 %v198_v20 }
  0xf0   :  { %812 = vmatmul.mubr.bf16.gmra.mxu1 %v199_v21  ;;  %v933_v22 = vpop.eup %932 }
  0xf2   :  { %v935_v23 = vpop.eup %934 }
  0xf4   :  { %v937_v24 = vpop.eup %936 }
  0xf5   :  { %v939_v25 = vpop.eup %938  ;;  %v200_v26 = vpack.c.bf16 %v937_v24, %v933_v22 }
  0xf6   :  { %v201_v27 = vpack.c.bf16 %v935_v23, %v939_v25 }
  0xf7   :  { %815 = vmatprep.mubr.bf16.mxu1 %v200_v26 }
  0xf8   :  { %816 = vmatmul.mubr.bf16.gmra.mxu1 %v201_v27  ;;  %v1026_v27 = vmov 0.0  }
  0xf9   :  { %851 = vmatprep.subr.mxu1 %v1026_v27  ;;  %883 = vmatprep.mubr.msk.f32.mxu1 %vm1027_vm1, %v1026_v27 }
 0x1a0   :  { %v805_v34 = vpop.f32.mrf.mxu1 }
 0x1a1   :  { %v314_v40 = vadd.f32 %v805_v34, %v677_v35 }
 0x1a2   :  { %v305_v36 = vpop.f32.mrf.mxu1 }
 0x1a3   :  { %v306_v37 = vadd.f32 %v677_v35, %v305_v36 }
 0x1a4   :  { %v806_v38 = vpop.f32.mrf.mxu1 }
 0x1a5   :  { %v317_v39 = vadd.f32 %v806_v38, %v677_v35  ;;  %940 = vtanh.f32 %v306_v37 }
 0x1a6   :  { %v308_v41 = vpop.f32.mrf.mxu1 }
 0x1a7   :  { %v309_v42 = vadd.f32 %v677_v35, %v308_v41  ;;  %942 = vtanh.f32 %v317_v39 }
 0x1a8   :  { %v809_v43 = vpop.f32.mrf.mxu1 }
 0x1a9   :  { %944 = vtanh.f32 %v309_v42  ;;  %v330_v48 = vadd.f32 %v809_v43, %v677_v35 }
 0x1aa   :  { %946 = vtanh.f32 %v314_v40  ;;  %v321_v44 = vpop.f32.mrf.mxu1 }
 0x1ab   :  { %v322_v45 = vadd.f32 %v677_v35, %v321_v44  ;;  %v1182_v44 = vld [vmem:[%s1227_s3 + $0x2] ss:$0 sm:$0xff] }
 0x1ac   :  { %v810_v46 = vpop.f32.mrf.mxu1 }
 0x1ad   :  { %v333_v47 = vadd.f32 %v810_v46, %v677_v35  ;;  %948 = vtanh.f32 %v322_v45 }
 0x1ae   :  { %v324_v49 = vpop.f32.mrf.mxu1 }
 0x1af   :  { %v325_v50 = vadd.f32 %v677_v35, %v324_v49  ;;  %950 = vtanh.f32 %v333_v47 }
 0x1b0   :  { %v813_v51 = vpop.f32.mrf.mxu1 }
 0x1b1   :  { %952 = vtanh.f32 %v325_v50  ;;  %v346_v59 = vadd.f32 %v813_v51, %v677_v35 }
 0x1b2   :  { %954 = vtanh.f32 %v330_v48  ;;  %v337_v52 = vpop.f32.mrf.mxu1  ;;  %v941_v54 = vpop.eup %940 }
 0x1b3   :  { %v338_v53 = vadd.f32 %v677_v35, %v337_v52 }
 0x1b4   :  { %v814_v55 = vpop.f32.mrf.mxu1  ;;  %v943_v56 = vpop.eup %942 }
 0x1b5   :  { %v349_v57 = vadd.f32 %v814_v55, %v677_v35  ;;  %956 = vtanh.f32 %v338_v53 }
 0x1b6   :  { %v945_v58 = vpop.eup %944  ;;  %v340_v60 = vpop.f32.mrf.mxu1 }
 0x1b7   :  { %v947_v61 = vpop.eup %946  ;;  %v341_v62 = vadd.f32 %v677_v35, %v340_v60  ;;  %v384_v63 = vpack.c.bf16 %v945_v58, %v941_v54  ;;  %958 = vtanh.f32 %v349_v57 }
 0x1b8   :  { %v817_v0 = vpop.f32.mrf.mxu1  ;;  %v385_v1 = vpack.c.bf16 %v943_v56, %v947_v61 }
 0x1b9   :  { %960 = vtanh.f32 %v341_v62  ;;  %835 = vmatprep.mubr.bf16.mxu0 %v384_v63  ;;  %v362_v9 = vadd.f32 %v817_v0, %v677_v35 }
 0x1ba   :  { %962 = vtanh.f32 %v346_v59  ;;  %v353_v2 = vpop.f32.mrf.mxu1  ;;  %836 = vmatmul.mubr.bf16.vlgmr.msra.gmra.mxu0 %v385_v1  ;;  %v949_v4 = vpop.eup %948 }
 0x1bb   :  { %v354_v3 = vadd.f32 %v677_v35, %v353_v2 }
 0x1bc   :  { %v818_v5 = vpop.f32.mrf.mxu1  ;;  %v951_v6 = vpop.eup %950 }
 0x1bd   :  { %v365_v7 = vadd.f32 %v818_v5, %v677_v35  ;;  %964 = vtanh.f32 %v354_v3 }
 0x1be   :  { %v953_v8 = vpop.eup %952  ;;  %v356_v10 = vpop.f32.mrf.mxu1 }
 0x1bf   :  { %v955_v11 = vpop.eup %954  ;;  %v357_v12 = vadd.f32 %v677_v35, %v356_v10  ;;  %v386_v13 = vpack.c.bf16 %v953_v8, %v949_v4  ;;  %966 = vtanh.f32 %v365_v7 }
 0x1c0   :  { %v387_v14 = vpack.c.bf16 %v951_v6, %v955_v11 }
 0x1c1   :  { %968 = vtanh.f32 %v357_v12  ;;  %839 = vmatprep.mubr.bf16.mxu0 %v386_v13 }
 0x1c2   :  { %970 = vtanh.f32 %v362_v9  ;;  %840 = vmatmul.mubr.bf16.gmra.mxu0 %v387_v14  ;;  %v957_v15 = vpop.eup %956 }
 0x1c4   :  { %v959_v16 = vpop.eup %958 }
 0x1c6   :  { %v961_v17 = vpop.eup %960 }
 0x1c7   :  { %v963_v18 = vpop.eup %962  ;;  %v388_v19 = vpack.c.bf16 %v961_v17, %v957_v15  ;;  %v575_v15 = vld [vmem:[%s1227_s3 + $0x3] sm:$0x1] }
 0x1c8   :  { %v389_v20 = vpack.c.bf16 %v959_v16, %v963_v18  ;;  %v580_v16 = vpop.permute.xlu0 %579 }
 0x1c9   :  { %843 = vmatprep.mubr.bf16.mxu0 %v388_v19 }
 0x1ca   :  { %844 = vmatmul.mubr.bf16.gmra.mxu0 %v389_v20  ;;  %v965_v21 = vpop.eup %964 }
 0x1cc   :  { %v967_v22 = vpop.eup %966 }
 0x1ce   :  { %v969_v23 = vpop.eup %968 }
 0x1cf   :  { %v971_v24 = vpop.eup %970  ;;  %v390_v25 = vpack.c.bf16 %v969_v23, %v965_v21 }
 0x1d0   :  { %v391_v26 = vpack.c.bf16 %v967_v22, %v971_v24 }
 0x1d1   :  { %847 = vmatprep.mubr.bf16.mxu0 %v390_v25 }
 0x1d2   :  { %848 = vmatmul.mubr.bf16.gmra.mxu0 %v391_v26 }
 0x27a   :  { %v1173_v30 = vpop.f32.mrf.mxu0 }
 0x27b   :  { %v505_v5 = vadd.f32 %v1173_v30, %v1182_v44 }
 0x27c   :  { %v1175_v31 = vpop.f32.mrf.mxu0 }
 0x27d   :  { %v497_v9 = vadd.f32 %v1182_v44, %v1175_v31 }
 0x27e   :  { %v838_v32 = vpop.f32.mrf.mxu0 }
 0x27f   :  { %v508_v3 = vadd.f32 %v838_v32, %v1182_v44 }
 0x280   :  { %v1177_v33 = vpop.f32.mrf.mxu0 }
 0x281   :  { %v500_v7 = vadd.f32 %v1182_v44, %v1177_v33 }
 0x282   :  { %v841_v34 = vpop.f32.mrf.mxu0 }
 0x283   :  { %v521_v61 = vadd.f32 %v841_v34, %v1182_v44 }
 0x284   :  { %v512_v35 = vpop.f32.mrf.mxu0 }
 0x285   :  { %v513_v1 = vadd.f32 %v1182_v44, %v512_v35 }
 0x286   :  { %v842_v36 = vpop.f32.mrf.mxu0 }
 0x287   :  { %v524_v59 = vadd.f32 %v842_v36, %v1182_v44 }
 0x288   :  { %v515_v37 = vpop.f32.mrf.mxu0 }
 0x289   :  { %v516_v63 = vadd.f32 %v1182_v44, %v515_v37 }
 0x28a   :  { %v845_v38 = vpop.f32.mrf.mxu0 }
 0x28b   :  { %v537_v53 = vadd.f32 %v845_v38, %v1182_v44 }
 0x28c   :  { %v528_v39 = vpop.f32.mrf.mxu0 }
 0x28d   :  { %v529_v57 = vadd.f32 %v1182_v44, %v528_v39 }
 0x28e   :  { %v846_v40 = vpop.f32.mrf.mxu0 }
 0x28f   :  { %v540_v51 = vadd.f32 %v846_v40, %v1182_v44 }
 0x290   :  { %v531_v41 = vpop.f32.mrf.mxu0 }
 0x291   :  { %v532_v55 = vadd.f32 %v1182_v44, %v531_v41 }
 0x292   :  { %v849_v42 = vpop.f32.mrf.mxu0 }
 0x293   :  { %v553_v47 = vadd.f32 %v849_v42, %v1182_v44 }
 0x294   :  { %v544_v43 = vpop.f32.mrf.mxu0 }
 0x295   :  { %v545_v50 = vadd.f32 %v1182_v44, %v544_v43 }
 0x296   :  { %v850_v45 = vpop.f32.mrf.mxu0 }
 0x297   :  { %v556_v46 = vadd.f32 %v850_v45, %v1182_v44 }
 0x298   :  { %v547_v48 = vpop.f32.mrf.mxu0 }
 0x299   :  { %972 = vtanh.f32 %v556_v46  ;;  %v548_v49 = vadd.f32 %v1182_v44, %v547_v48 }
 0x29a   :  { %974 = vtanh.f32 %v553_v47 }
 0x29b   :  { %976 = vtanh.f32 %v548_v49 }
 0x29c   :  { %978 = vtanh.f32 %v545_v50 }
 0x29d   :  { %980 = vtanh.f32 %v540_v51 }
 0x29e   :  { %982 = vtanh.f32 %v537_v53 }
 0x29f   :  { %984 = vtanh.f32 %v532_v55 }
 0x2a0   :  { %986 = vtanh.f32 %v529_v57 }
 0x2a1   :  { %988 = vtanh.f32 %v524_v59 }
 0x2a2   :  { %990 = vtanh.f32 %v521_v61 }
 0x2a3   :  { %992 = vtanh.f32 %v516_v63 }
 0x2a4   :  { %994 = vtanh.f32 %v513_v1 }
 0x2a5   :  { %996 = vtanh.f32 %v508_v3 }
 0x2a6   :  { %v973_v52 = vpop.eup %972  ;;  %998 = vtanh.f32 %v505_v5 }
 0x2a7   :  { %852 = vmatpush3.xpose.msra.mxu1 %v973_v52  ;;  %v975_v54 = vpop.eup %974  ;;  %1000 = vtanh.f32 %v500_v7 }
 0x2a8   :  { %853 = vmatprep.subr.mxu1 %v1026_v27  ;;  %v977_v56 = vpop.eup %976  ;;  %1002 = vtanh.f32 %v497_v9 }
 0x2a9   :  { %v979_v58 = vpop.eup %978 }
 0x2aa   :  { %v981_v60 = vpop.eup %980 }
 0x2ab   :  { %854 = vmatpush3.xpose.msra.mxu1 %v975_v54  ;;  %v983_v62 = vpop.eup %982 }
 0x2ac   :  { %855 = vmatprep.subr.mxu1 %v1026_v27  ;;  %v985_v0 = vpop.eup %984 }
 0x2ad   :  { %v987_v2 = vpop.eup %986 }
 0x2ae   :  { %v989_v4 = vpop.eup %988 }
 0x2af   :  { %856 = vmatpush3.xpose.msra.mxu1 %v977_v56  ;;  %v991_v6 = vpop.eup %990 }
 0x2b0   :  { %857 = vmatprep.subr.mxu1 %v1026_v27  ;;  %v993_v8 = vpop.eup %992 }
 0x2b1   :  { %v995_v10 = vpop.eup %994 }
 0x2b2   :  { %v997_v11 = vpop.eup %996 }
 0x2b3   :  { %858 = vmatpush3.xpose.msra.mxu1 %v979_v58  ;;  %v999_v12 = vpop.eup %998 }
 0x2b4   :  { %859 = vmatprep.subr.mxu1 %v1026_v27  ;;  %v1001_v13 = vpop.eup %1000 }
 0x2b5   :  { %v1003_v14 = vpop.eup %1002 }
 0x2b7   :  { %860 = vmatpush3.xpose.msra.mxu1 %v981_v60 }
 0x2b8   :  { %861 = vmatprep.subr.mxu1 %v1026_v27 }
 0x2bb   :  { %862 = vmatpush3.xpose.msra.mxu1 %v983_v62 }
 0x2bc   :  { %863 = vmatprep.subr.mxu1 %v1026_v27 }
 0x2bf   :  { %864 = vmatpush3.xpose.msra.mxu1 %v985_v0 }
 0x2c0   :  { %865 = vmatprep.subr.mxu1 %v1026_v27 }
 0x2c3   :  { %866 = vmatpush3.xpose.msra.mxu1 %v987_v2 }
 0x2c4   :  { %867 = vmatprep.subr.mxu1 %v1026_v27 }
 0x2c7   :  { %868 = vmatpush3.xpose.msra.mxu1 %v989_v4 }
 0x2c8   :  { %869 = vmatprep.subr.mxu1 %v1026_v27 }
 0x2cb   :  { %870 = vmatpush3.xpose.msra.mxu1 %v991_v6 }
 0x2cc   :  { %871 = vmatprep.subr.mxu1 %v1026_v27 }
 0x2cf   :  { %872 = vmatpush3.xpose.msra.mxu1 %v993_v8 }
 0x2d0   :  { %873 = vmatprep.subr.mxu1 %v1026_v27 }
 0x2d3   :  { %874 = vmatpush3.xpose.msra.mxu1 %v995_v10 }
 0x2d4   :  { %875 = vmatprep.subr.mxu1 %v1026_v27 }
 0x2d7   :  { %876 = vmatpush3.xpose.msra.mxu1 %v997_v11 }
 0x2d8   :  { %877 = vmatprep.subr.mxu1 %v1026_v27 }
 0x2db   :  { %878 = vmatpush3.xpose.msra.mxu1 %v999_v12 }
 0x2dc   :  { %879 = vmatprep.subr.mxu1 %v1026_v27 }
 0x2df   :  { %880 = vmatpush3.xpose.msra.mxu1 %v1001_v13 }
 0x2e0   :  { %881 = vmatprep.subr.mxu1 %v1026_v27 }
 0x2e3   :  { %882 = vmatpush3.xpose.msra.mxu1 %v1003_v14 }
 0x2e6   :  { %884 = vmatmul.mubr.f32.vlgmr.msra.gmra.mxu1 %v575_v15 }
 0x3a6   :  { %v648_v17 = vpop.f32.mrf.mxu1 }
 0x3a7   :  { %v649_v18 = vadd.f32 %v648_v17, %v580_v16 }
 0x3a8   :  { %v885_v19 = vpop.f32.mrf.mxu1 }
 0x3a9   :  { %652 = vst [vmem:[#allocation2] sm:$0x1] %v649_v18 }
 0x3aa   :  { %1015 = shalt.err (!%p1012_p4)
}
 0x3ab   :  { %662 = dma.vmem_to_hbm [thread:$0]  %s660_s8, 16, %s1228_s4, [#allocation3]  }
 0x3ac   :  { %1024 = dma.done.wait [#allocation3], 16  }
 0x3ad   :  { %1025 = vsyncadd [#allocation3], 4294967280 }
 0x3ae   :  { %666 = vsyncpa [#allocation3], 1 }

</bundles_post_ra>
